<compile_context>
chip_gen: v7x
topology: tpu7x:2x2x1
jax: 0.10.0
libtpu: 0.0.40
codegen_flags: <defaults>
</compile_context>

<pallas_src>
import math

import jax
import jax.numpy as jnp
from jax.experimental import pallas as pl
from jax.experimental.pallas import tpu as pltpu


_SUBLANES = 8  # broadcast the single live row across one full vreg of sublanes


def _lstm_cell_kernel(x_ref, h_ref, c_ref, w_ih_ref, w_hh_ref, b_ref, hc_ref):
    """Fused single LSTM-cell step (PyTorch gate order i, f, g, o).

    x_ref:    (1, E)    input row
    h_ref:    (1, H)    previous hidden state
    c_ref:    (1, H)    previous cell state
    w_ih_ref: (E, 4H)   W_ih^T
    w_hh_ref: (H, 4H)   W_hh^T
    b_ref:    (1, 4H)   combined bias  b_ih + b_hh
    hc_ref:   (1, 2H)   output slab [h_new | c_new]
    """
    H = c_ref.shape[-1]

    # Sublane-broadcast the single live row so the MXU gets a full-height tile.
    x8 = jnp.broadcast_to(x_ref[...], (_SUBLANES, x_ref.shape[-1]))
    h8 = jnp.broadcast_to(h_ref[...], (_SUBLANES, h_ref.shape[-1]))

    # Two accumulating MXU dots against the two weight halves + bias add.
    gates = (jnp.dot(x8, w_ih_ref[...], preferred_element_type=jnp.float32)
             + jnp.dot(h8, w_hh_ref[...], preferred_element_type=jnp.float32)
             + b_ref[...])                                   # (8, 4H), rows identical

    # One EUP sigmoid over the whole gates vreg, one tanh over the g chunk.
    sig = jax.nn.sigmoid(gates)
    i_g = sig[0:1, 0 * H:1 * H]
    f_g = sig[0:1, 1 * H:2 * H]
    o_g = sig[0:1, 3 * H:4 * H]
    g_g = jnp.tanh(gates[0:1, 2 * H:3 * H])

    c_new = f_g * c_ref[...] + i_g * g_g                     # (1, H)
    h_new = o_g * jnp.tanh(c_new)                            # (1, H)

    # Single lane-dense output slab; only the live row is stored.
    hc_ref[:, 0:H] = h_new
    hc_ref[:, H:2 * H] = c_new


def lstm_cell_pallas(x, h, c, w_ih_t, w_hh_t, bias):
    """x: (1, E); h, c: (1, H); w_ih_t: (E, 4H); w_hh_t: (H, 4H); bias: (1, 4H).

    Returns hc: (1, 2H) fused slab [h_new | c_new].
    """
    E = x.shape[-1]
    H = h.shape[-1]
    vmem = pl.BlockSpec(memory_space=pltpu.MemorySpace.VMEM)
    cost = pl.CostEstimate(
        flops=2 * _SUBLANES * (E + H) * 4 * H,
        transcendentals=_SUBLANES * 4 * H + 2 * H,
        bytes_accessed=4 * ((E + H) * 4 * H + 4 * H + E + 2 * H + 2 * H),
    )
    hc = pl.pallas_call(
        _lstm_cell_kernel,
        out_shape=jax.ShapeDtypeStruct((1, 2 * H), jnp.float32),
        in_specs=[vmem, vmem, vmem, vmem, vmem, vmem],
        out_specs=vmem,
        cost_estimate=cost,
    )(x, h, c, w_ih_t, w_hh_t, bias)
    return hc


@jax.jit
def _encoder_step(x_flat, h0, c0, w_ih_t, w_hh_t, bias):
    """One LSTM cell step. x_flat: (E,), h0/c0: (1,1,H). Returns h', c' as (1,1,H)."""
    E = x_flat.shape[0]
    H = h0.shape[-1]
    x = jnp.reshape(x_flat, (1, E)).astype(jnp.float32)
    h = jnp.reshape(h0, (1, H)).astype(jnp.float32)
    c = jnp.reshape(c0, (1, H)).astype(jnp.float32)

    hc = lstm_cell_pallas(x, h, c, w_ih_t, w_hh_t, bias)     # (1, 2H)

    h_new = jnp.reshape(hc[:, 0:H], (1, 1, H))
    c_new = jnp.reshape(hc[:, H:2 * H], (1, 1, H))
    return h_new, c_new


class EncoderLSTMPallas:
    """Mirrors EncoderLSTM: one nn.LSTM(embedding_dim, hidden_dim) layer."""

    def __init__(self, embedding_dim, hidden_dim, key):
        self.embedding_dim = embedding_dim
        self.hidden_dim = hidden_dim
        k = 1.0 / math.sqrt(hidden_dim)
        k1, k2, k3, k4 = jax.random.split(key, 4)
        # PyTorch LSTM parameter shapes: W_ih (4H, E), W_hh (4H, H), biases (4H,)
        self.w_ih = jax.random.uniform(k1, (4 * hidden_dim, embedding_dim),
                                       jnp.float32, -k, k)
        self.w_hh = jax.random.uniform(k2, (4 * hidden_dim, hidden_dim),
                                       jnp.float32, -k, k)
        self.b_ih = jax.random.uniform(k3, (4 * hidden_dim,), jnp.float32, -k, k)
        self.b_hh = jax.random.uniform(k4, (4 * hidden_dim,), jnp.float32, -k, k)

        # Hoisted weight prep (done once, not per forward call):
        #   W_ih^T -> (E, 4H), W_hh^T -> (H, 4H), combined bias -> (1, 4H)
        self.w_ih_t = jnp.transpose(self.w_ih)
        self.w_hh_t = jnp.transpose(self.w_hh)
        self.bias = jnp.reshape(self.b_ih + self.b_hh, (1, 4 * hidden_dim))

    def init_hidden(self):
        return (jnp.zeros((1, 1, self.hidden_dim), jnp.float32),
                jnp.zeros((1, 1, self.hidden_dim), jnp.float32))

    def forward(self, inputs, hidden):
        # inputs.view(1, 1, -1): flatten everything into one vector of size E.
        x_flat = jnp.reshape(inputs, (self.embedding_dim,)).astype(jnp.float32)
        h0, c0 = hidden
        h_new, c_new = _encoder_step(x_flat, h0, c0,
                                     self.w_ih_t, self.w_hh_t, self.bias)
        lstm_out = h_new                 # seq_len = 1  ->  lstm_out == h_n
        return lstm_out, (h_new, c_new)


def _reference_forward(model, inputs, hidden):
    """Pure-JAX reference of the same LSTM cell (for correctness check)."""
    H = model.hidden_dim
    x = jnp.reshape(inputs, (1, model.embedding_dim))
    h = jnp.reshape(hidden[0], (1, H))
    c = jnp.reshape(hidden[1], (1, H))
    gates = x @ model.w_ih.T + model.b_ih + h @ model.w_hh.T + model.b_hh
    i_g = jax.nn.sigmoid(gates[:, 0 * H:1 * H])
    f_g = jax.nn.sigmoid(gates[:, 1 * H:2 * H])
    g_g = jnp.tanh(gates[:, 2 * H:3 * H])
    o_g = jax.nn.sigmoid(gates[:, 3 * H:4 * H])
    c_new = f_g * c + i_g * g_g
    h_new = o_g * jnp.tanh(c_new)
    return h_new, c_new


if __name__ == "__main__":
    EMBEDDING_DIM = 32
    HIDDEN_DIM = 32

    key = jax.random.PRNGKey(0)
    k_param, k_in = jax.random.split(key)

    model = EncoderLSTMPallas(EMBEDDING_DIM, HIDDEN_DIM, k_param)

    # inputs: anything that flattens to EMBEDDING_DIM (matches inputs.view(1,1,-1))
    inputs = jax.random.normal(k_in, (1, EMBEDDING_DIM), jnp.float32)
    hidden = model.init_hidden()

    lstm_out, (h_n, c_n) = model.forward(inputs, hidden)
    jax.block_until_ready((lstm_out, h_n, c_n))

    # Sanity check against a pure-JAX f32 reference of the same cell.
    h_ref, c_ref = _reference_forward(model, inputs, hidden)
    assert jnp.allclose(jnp.reshape(lstm_out, (1, HIDDEN_DIM)), h_ref,
                        atol=1e-5, rtol=1e-5)
    assert jnp.allclose(jnp.reshape(c_n, (1, HIDDEN_DIM)), c_ref,
                        atol=1e-5, rtol=1e-5)

    print("KERNEL_OK")
</pallas_src>

<mosaic_0001>
module attributes {stable_mosaic.version = 11 : i64} {
  func.func @_lstm_cell_kernel(%arg0: memref<1x32xf32, #tpu.memory_space<vmem>>, %arg1: memref<1x32xf32, #tpu.memory_space<vmem>>, %arg2: memref<1x32xf32, #tpu.memory_space<vmem>>, %arg3: memref<32x128xf32, #tpu.memory_space<vmem>>, %arg4: memref<32x128xf32, #tpu.memory_space<vmem>>, %arg5: memref<1x128xf32, #tpu.memory_space<vmem>>, %arg6: memref<1x64xf32, #tpu.memory_space<vmem>>) attributes {dimension_semantics = [], scalar_prefetch = 0 : i64, scratch_operands = 0 : i64, tpu.core_type = #tpu.core_type<tc>} {
    %c0 = arith.constant 0 : index
    %c0_0 = arith.constant 0 : index
    %0 = vector.load %arg0[%c0, %c0_0] : memref<1x32xf32, #tpu.memory_space<vmem>>, vector<1x32xf32>
    %1 = vector.shape_cast %0 : vector<1x32xf32> to vector<1x32xf32>
    %2 = vector.broadcast %1 : vector<1x32xf32> to vector<8x32xf32>
    %c0_1 = arith.constant 0 : index
    %c0_2 = arith.constant 0 : index
    %3 = vector.load %arg1[%c0_1, %c0_2] : memref<1x32xf32, #tpu.memory_space<vmem>>, vector<1x32xf32>
    %4 = vector.shape_cast %3 : vector<1x32xf32> to vector<1x32xf32>
    %5 = vector.broadcast %4 : vector<1x32xf32> to vector<8x32xf32>
    %c0_3 = arith.constant 0 : index
    %c0_4 = arith.constant 0 : index
    %6 = vector.load %arg3[%c0_3, %c0_4] : memref<32x128xf32, #tpu.memory_space<vmem>>, vector<32x128xf32>
    %cst = arith.constant dense<0.000000e+00> : vector<8x128xf32>
    %7 = tpu.matmul %2, %6, %cst {dimension_numbers = #tpu.dot_dimension_numbers<[1], [0], [0], [1], [0, 0, 1, 1], [], []>} : vector<8x32xf32>, vector<32x128xf32>, vector<8x128xf32> -> vector<8x128xf32>
    %c0_5 = arith.constant 0 : index
    %c0_6 = arith.constant 0 : index
    %8 = vector.load %arg4[%c0_5, %c0_6] : memref<32x128xf32, #tpu.memory_space<vmem>>, vector<32x128xf32>
    %cst_7 = arith.constant dense<0.000000e+00> : vector<8x128xf32>
    %9 = tpu.matmul %5, %8, %cst_7 {dimension_numbers = #tpu.dot_dimension_numbers<[1], [0], [0], [1], [0, 0, 1, 1], [], []>} : vector<8x32xf32>, vector<32x128xf32>, vector<8x128xf32> -> vector<8x128xf32>
    %10 = arith.addf %7, %9 : vector<8x128xf32>
    %c0_8 = arith.constant 0 : index
    %c0_9 = arith.constant 0 : index
    %11 = vector.load %arg5[%c0_8, %c0_9] : memref<1x128xf32, #tpu.memory_space<vmem>>, vector<1x128xf32>
    %12 = vector.broadcast %11 : vector<1x128xf32> to vector<8x128xf32>
    %13 = arith.addf %10, %12 : vector<8x128xf32>
    %14 = arith.negf %13 : vector<8x128xf32>
    %15 = math.exp %14 : vector<8x128xf32>
    %cst_10 = arith.constant 1.000000e+00 : f32
    %16 = vector.broadcast %cst_10 : f32 to vector<8x128xf32>
    %17 = arith.addf %16, %15 : vector<8x128xf32>
    %18 = arith.divf %16, %17 : vector<8x128xf32>
    %19 = vector.extract_strided_slice %18 {offsets = [0, 0], sizes = [1, 32], strides = [1, 1]} : vector<8x128xf32> to vector<1x32xf32>
    %20 = vector.extract_strided_slice %18 {offsets = [0, 32], sizes = [1, 32], strides = [1, 1]} : vector<8x128xf32> to vector<1x32xf32>
    %21 = vector.extract_strided_slice %18 {offsets = [0, 96], sizes = [1, 32], strides = [1, 1]} : vector<8x128xf32> to vector<1x32xf32>
    %22 = vector.extract_strided_slice %13 {offsets = [0, 64], sizes = [1, 32], strides = [1, 1]} : vector<8x128xf32> to vector<1x32xf32>
    %23 = math.tanh %22 : vector<1x32xf32>
    %c0_11 = arith.constant 0 : index
    %c0_12 = arith.constant 0 : index
    %24 = vector.load %arg2[%c0_11, %c0_12] : memref<1x32xf32, #tpu.memory_space<vmem>>, vector<1x32xf32>
    %25 = arith.mulf %20, %24 : vector<1x32xf32>
    %26 = arith.mulf %19, %23 : vector<1x32xf32>
    %27 = arith.addf %25, %26 : vector<1x32xf32>
    %28 = math.tanh %27 : vector<1x32xf32>
    %29 = arith.mulf %21, %28 : vector<1x32xf32>
    %c0_13 = arith.constant 0 : index
    %c0_14 = arith.constant 0 : index
    %30 = vector.load %arg6[%c0_13, %c0_14] : memref<1x64xf32, #tpu.memory_space<vmem>>, vector<1x32xf32>
    tpu.vector_store %arg6[%c0_13, %c0_14], %29 {strides = array<i32>} : memref<1x64xf32, #tpu.memory_space<vmem>>, vector<1x32xf32>,
    %c0_15 = arith.constant 0 : index
    %c32 = arith.constant 32 : index
    %31 = vector.load %arg6[%c0_15, %c32] : memref<1x64xf32, #tpu.memory_space<vmem>>, vector<1x32xf32>
    tpu.vector_store %arg6[%c0_15, %c32], %27 {strides = array<i32>} : memref<1x64xf32, #tpu.memory_space<vmem>>, vector<1x32xf32>,
    return
  }
}

</mosaic_0001>

<bundles_post_ra>
// kernel: _encoder_step.1
= control target key start
LH: loop header
LB: loop body
LE: loop exit
PB: predicated region body
PF: predicated region fallthrough
CT: control target
= control target key end

     0   :  { %11 = vsyncpa [#allocation3], 0  ;;  %s473_s0 = inlined_call_operand.vmem [shape: f32[1,32], index: 0, kind: input, shape index: {}]   ;;  %s474_s1 = inlined_call_operand.vmem [shape: f32[1,32], index: 1, kind: input, shape index: {}]   ;;  %s475_s2 = inlined_call_operand.vmem [shape: f32[1,32], index: 2, kind: input, shape index: {}]   ;;  %s476_s3 = inlined_call_operand.hbm [shape: f32[32,128], index: 3, kind: input, shape index: {}]   ;;  %s477_s4 = inlined_call_operand.hbm [shape: f32[32,128], index: 4, kind: input, shape index: {}]   ;;  %s478_s5 = inlined_call_operand.vmem [shape: f32[1,128], index: 5, kind: input, shape index: {}]   ;;  %s479_s6 = inlined_call_operand.vmem [shape: f32[1,64], index: 6, kind: output, shape index: {}]  }
   0x1   :  { %12 = vsyncpa [#allocation5], 0  ;;  %s387_s21 = smov [#allocation2]   ;;  %s339_s25 = scalar_lea.hbm %s476_s3, 512 }
   0x2   :  { %s24_s22 = sshll.u32 %s387_s21, 4  ;;  %p340_p0 = scmp.ne.s32.totalorder %s476_s3, %s339_s25  ;;  %s25_s22 = int_to_ptr.vmem [resolvable:$true] %s24_s22 }
   0x3   :  { %p343_p1 = scmp.lt.u32.totalorder %s339_s25, %s476_s3 }
   0x5   :  { %p345_p2 = pnand %p343_p1, %p340_p0 }
   0x7   :  { %348 = shalt.err (!%p345_p2)
}
   0x8   :  { %s349_s30 = scalar_lea.vmem %s25_s22, 512  ;;  %p354_p4 = scmp.lt.s32.totalorder %s25_s22, %s25_s22 }
   0x9   :  { %p350_p3 = scmp.ne.s32.totalorder %s25_s22, %s349_s30  ;;  %p355_p5 = scmp.lt.s32.totalorder %s349_s30, %s349_s30 }
   0xb   :  { %p356_p6 = por %p355_p5, %p354_p4 }
   0xd   :  { %p357_p7 = pnand %p356_p6, %p350_p3 }
   0xf   :  { %360 = shalt.err (!%p357_p7)
}
  0x10   :  { %s388_s7 = smov 128   ;;  %s389_s8 = smov 8  }
  0x11   :  { %30 = dma.hbm_to_vmem [thread:$0]  %s476_s3, 512, %s25_s22, [#allocation3], %s388_s7, %s388_s7, %s389_s8  }
  0x12   :  { %s390_s11 = smov [#allocation4]   ;;  %s361_s15 = scalar_lea.hbm %s477_s4, 512 }
  0x13   :  { %s36_s12 = sshll.u32 %s390_s11, 4  ;;  %p362_p8 = scmp.ne.s32.totalorder %s477_s4, %s361_s15  ;;  %s37_s12 = int_to_ptr.vmem [resolvable:$true] %s36_s12 }
  0x14   :  { %p365_p9 = scmp.lt.u32.totalorder %s361_s15, %s477_s4 }
  0x16   :  { %p367_p10 = pnand %p365_p9, %p362_p8 }
  0x18   :  { %370 = shalt.err (!%p367_p10)
}
  0x19   :  { %s371_s20 = scalar_lea.vmem %s37_s12, 512  ;;  %p376_p12 = scmp.lt.s32.totalorder %s37_s12, %s37_s12 }
  0x1a   :  { %p372_p11 = scmp.ne.s32.totalorder %s37_s12, %s371_s20  ;;  %p377_p13 = scmp.lt.s32.totalorder %s371_s20, %s371_s20 }
  0x1c   :  { %p378_p0 = por %p377_p13, %p376_p12 }
  0x1e   :  { %p379_p1 = pnand %p378_p0, %p372_p11 }
  0x20   :  { %382 = shalt.err (!%p379_p1)
}
  0x21   :  { %42 = dma.hbm_to_vmem [thread:$0]  %s477_s4, 512, %s37_s12, [#allocation5], %s388_s7, %s388_s7, %s389_s8  }
  0x22   :  { %383 = dma.done.wait [#allocation3], 512  }
  0x23   :  { %384 = vsyncadd [#allocation3], 4294966784 }
  0x24   :  { %385 = dma.done.wait [#allocation5], 512  }
  0x25   :  { %386 = vsyncadd [#allocation5], 4294966784  ;;  %v391_v0 = vmov 0.0|0.0   ;;  %vm392_vm0 = vmmov 0   ;;  %v393_v1 = vmov 0.0   ;;  %v67_v2 = vld [vmem:[#allocation4] sm:$0xff] }
  0x26   :  { %310 = vmatprep.subr.bf16.mxu0 %v391_v0  ;;  %316 = vmatprep.subr.bf16.mxu1 %v391_v0  ;;  %v68_v3 = vld [vmem:[#allocation4 + $0x8] sm:$0xff]  ;;  %v63_v4 = vld [vmem:[#allocation2] sm:$0xff]  ;;  %v69_v7 = vld [vmem:[#allocation4 + $0x10] sm:$0xff]  ;;  %vm71_vm1 = vcmask 261120   ;;  %vm261_vm2 = vcmask 253952   ;;  %vm263_vm3 = vcmask 516352  }
  0x27   :  { %296 = vmatprep.mubr.msk.f32.mxu0 %vm392_vm0, %v393_v1  ;;  %307 = vmatprep.mubr.msk.f32.mxu1 %vm392_vm0, %v393_v1  ;;  %v311_v5 = vpack.c.bf16 %v68_v3, %v67_v2  ;;  %v64_v6 = vld [vmem:[#allocation2 + $0x8] sm:$0xff]  ;;  %v70_v8 = vld [vmem:[#allocation4 + $0x18] sm:$0xff]  ;;  %v65_v10 = vld [vmem:[#allocation2 + $0x10] sm:$0xff] }
  0x28   :  { %v317_v9 = vpack.c.bf16 %v64_v6, %v63_v4  ;;  %v66_v11 = vld [vmem:[#allocation2 + $0x18] sm:$0xff]  ;;  %v314_v12 = vpack.c.bf16 %v70_v8, %v69_v7  ;;  %v272_v14 = vld [vmem:[%s474_s1] ss:$0 sm:$0xff]  ;;  %s394_s1 = smov 64  }
  0x29   :  { %312 = vmatpush3.bf16.msra.mxu0 %v311_v5  ;;  %v320_v13 = vpack.c.bf16 %v66_v11, %v65_v10  ;;  %v271_v15 = vld [vmem:[%s473_s0] ss:$0 sm:$0xff]  ;;  %s395_s0 = smov 32  }
  0x2a   :  { %318 = vmatpush3.bf16.msra.mxu1 %v317_v9  ;;  %313 = vmatprep.subr.bf16.mxu0 %v391_v0  ;;  %v275_v18 = vld [vmem:[%s478_s5] ss:$0 sm:$0xff] }
  0x2b   :  { %319 = vmatprep.subr.bf16.mxu1 %v391_v0  ;;  %v277_v24 = vld [vmem:[%s475_s2] ss:$0 sm:$0xff] }
  0x2d   :  { %315 = vmatpush3.bf16.msra.mxu0 %v314_v12 }
  0x2e   :  { %321 = vmatpush3.bf16.msra.mxu1 %v320_v13 }
  0x30   :  { %297 = vmatmul.mubr.msk.f32.vlgmr.msra.gmra.mrb[0].mxu0 %vm71_vm1, %v272_v14 }
  0x31   :  { %308 = vmatmul.mubr.msk.f32.vlgmr.msra.gmra.mrb[0].mxu1 %vm71_vm1, %v271_v15 }
 0x103   :  { %v140_v16 = vpop.f32.mrb[0].mxu0 }
 0x104   :  { %v212_v17 = vpop.f32.mrb[0].mxu1  ;;  %v298_v19 = vpop.f32.mrb[1].mxu0 }
 0x105   :  { %v213_v20 = vadd.f32 %v212_v17, %v140_v16  ;;  %v309_v21 = vpop.f32.mrb[1].mxu1 }
 0x107   :  { %v223_v22 = vadd.f32 %v275_v18, %v213_v20 }
 0x109   :  { %331 = vtanh.f32 %v223_v22  ;;  %v276_v25 = vmul.f32 -1.442695, %v223_v22 }
 0x10b   :  { %333 = vpow2.f32 %v276_v25 }
 0x113   :  { %v332_v23 = vpop.eup %331 }
 0x114   :  { %242 = vrot.lane.b32.xlu0 %v332_v23, %s394_s1 }
 0x115   :  { %v334_v26 = vpop.eup %333 }
 0x116   :  { %v227_v27 = vadd.f32 1.0, %v334_v26 }
 0x118   :  { %237 = vrot.lane.b32.xlu0 %v277_v24, %s395_s0  ;;  %335 = vrcp.f32 %v227_v27 }
 0x122   :  { %v336_v28 = vpop.eup %335 }
 0x186   :  { %v243_v29 = vpop.permute.xlu0 %242 }
 0x187   :  { %v245_v30 = vmul.f32 %v336_v28, %v243_v29 }
 0x189   :  { %247 = vrot.lane.b32.xlu1 %v245_v30, %s395_s0 }
 0x18a   :  { %v238_v31 = vpop.permute.xlu0 %237 }
 0x18b   :  { %v240_v32 = vmul.f32 %v336_v28, %v238_v31 }
 0x1fb   :  { %v248_v33 = vpop.permute.xlu1 %247 }
 0x1fc   :  { %v250_v34 = vadd.f32 %v248_v33, %v240_v32 }
 0x1fe   :  { %337 = vtanh.f32 %v250_v34 }
 0x208   :  { %v338_v35 = vpop.eup %337 }
 0x209   :  { %253 = vrot.lane.b32.xlu1 %v338_v35, %s394_s1 }
 0x27b   :  { %v254_v36 = vpop.permute.xlu1 %253 }
 0x27c   :  { %v256_v37 = vmul.f32 %v336_v28, %v254_v36 }
 0x27e   :  { %258 = vrot.lane.b32.xlu0 %v256_v37, %s395_s0 }
 0x2f0   :  { %v259_v38 = vpop.permute.xlu0 %258 }
 0x2f1   :  { %262 = vst.msk [vmem:[%s479_s6] sm:$0x1] %vm261_vm2, %v259_v38 }
 0x2f2   :  { %264 = vst.msk [vmem:[%s479_s6] sm:$0x1] %vm263_vm3, %v250_v34 }
 0x2f3   :  { %269 = vsyncpa [#allocation3], 1 }
 0x2f4   :  { %270 = vsyncpa [#allocation5], 1 }

</bundles_post_ra>
